<compile_context>
chip_gen: v6e
topology: v6e:2x2x1
jax: 0.10.0
libtpu: 0.0.40
codegen_flags: <defaults>
</compile_context>

<pallas_src>
import functools

import jax
import jax.numpy as jnp
import numpy as np
from jax.experimental import pallas as pl
from jax.experimental.pallas import tpu as pltpu


def _extract_block_kernel(x_ref, masks_ref, wf_ref, bf_ref, w2_ref, b2_ref,
                          w3_ref, b3_ref, out_ref, *, W, HW, cout_p, mm_dtype):
    x = x_ref[0].astype(jnp.float32)                       # (Cin_p, HW)

    # Tap order t = dy*3 + dx, relative offset (ry, rx) = (dy-1, dx-1).
    offs = [ry * W + rx for ry in (-1, 0, 1) for rx in (-1, 0, 1)]
    mrows = [masks_ref[t] for t in range(9)]               # (1, HW) each, hoisted

    def patches(a):
        """a: (C, HW) f32 -> im2col matrix (9*C, HW), zero-padded at borders."""
        pieces = []
        for t, o in enumerate(offs):
            shifted = a if o == 0 else pltpu.roll(a, (-o) % HW, 1)
            pieces.append(shifted * mrows[t])               # mask = implicit padding
        return jnp.concatenate(pieces, axis=0)              # aligned sublane concat

    def conv(a, w_ref, b_ref):
        p = patches(a)
        return jnp.dot(w_ref[...].astype(mm_dtype), p.astype(mm_dtype),
                       preferred_element_type=jnp.float32) + b_ref[...]

    # Fused: short conv + first long conv (both read x) in one matmul.
    r = conv(x, wf_ref, bf_ref)                              # (2*Cout_p, HW)
    short = r[:cout_p]
    a = r[cout_p:]
    a = a * jax.nn.sigmoid(a)                                # SiLU (f32)

    a = conv(a, w2_ref, b2_ref)
    a = a * jax.nn.sigmoid(a)                                # SiLU (f32)

    a = conv(a, w3_ref, b3_ref)
    # TODO(synk): Dropout(0.1) is identity in eval mode; train mode would use
    # pltpu.prng_seed / pltpu.prng_random_bits for the mask.

    out_ref[0] = jnp.maximum(a + short, 0.0).astype(out_ref.dtype)


def _round_up(n, m):
    return ((n + m - 1) // m) * m


def extract_block_forward(x_nchw, params, *, matmul_dtype=jnp.float32):
    """x_nchw: (N, Cin, H, W) -> (N, Cout, H, W), matching the torch module."""
    N, Cin, H, W = x_nchw.shape
    Cout = params["w_short"].shape[-1]
    HW = H * W
    cin_p = _round_up(Cin, 8)
    cout_p = _round_up(Cout, 8)

    # NCHW -> (N, C, H*W): pure reshape (no data movement).  Pad channels to
    # the 8-sublane tile so all in-kernel sublane ops are tile-aligned.
    x = x_nchw.reshape(N, Cin, HW)
    if cin_p != Cin:
        x = jnp.pad(x, ((0, 0), (0, cin_p - Cin), (0, 0)))

    def wmat(w, ci_p, co_p):
        # (3, 3, Ci, Co) HWIO -> (Co_p, 9 * Ci_p), zero-padded channels.
        ci, co = w.shape[2], w.shape[3]
        w = jnp.pad(w, ((0, 0), (0, 0), (0, ci_p - ci), (0, co_p - co)))
        return jnp.transpose(w, (3, 0, 1, 2)).reshape(co_p, 9 * ci_p)

    def bcol(b, co_p):
        return jnp.pad(b, (0, co_p - b.shape[0])).reshape(co_p, 1)

    # Fuse the two convs that read x (short + long conv 1) along Cout.
    w_fused = jnp.concatenate([wmat(params["w_short"], cin_p, cout_p),
                               wmat(params["w_l1"], cin_p, cout_p)], axis=0)
    b_fused = jnp.concatenate([bcol(params["b_short"], cout_p),
                               bcol(params["b_l1"], cout_p)], axis=0)
    w2 = wmat(params["w_l2"], cout_p, cout_p)
    b2 = bcol(params["b_l2"], cout_p)
    w3 = wmat(params["w_l3"], cout_p, cout_p)
    b3 = bcol(params["b_l3"], cout_p)

    # Per-tap boundary masks over the flattened spatial axis.  These implement
    # the conv's zero padding without any halo buffer or wrapper-side pad.
    yy, xx = np.meshgrid(np.arange(H), np.arange(W), indexing="ij")
    masks_np = np.stack([
        ((yy + ry >= 0) & (yy + ry < H) & (xx + rx >= 0) & (xx + rx < W))
        .reshape(-1)
        for ry in (-1, 0, 1) for rx in (-1, 0, 1)
    ]).astype(np.float32).reshape(9, 1, HW)
    masks = jnp.asarray(masks_np)

    kernel = functools.partial(_extract_block_kernel, W=W, HW=HW,
                               cout_p=cout_p, mm_dtype=matmul_dtype)

    def full_spec(arr):
        return pl.BlockSpec(arr.shape, lambda n: (0,) * arr.ndim)

    out = pl.pallas_call(
        kernel,
        out_shape=jax.ShapeDtypeStruct((N, cout_p, HW), x_nchw.dtype),
        grid_spec=pltpu.PrefetchScalarGridSpec(
            num_scalar_prefetch=0,
            grid=(N,),
            in_specs=[
                pl.BlockSpec((1, cin_p, HW), lambda n: (n, 0, 0)),
                full_spec(masks),
                full_spec(w_fused), full_spec(b_fused),
                full_spec(w2), full_spec(b2),
                full_spec(w3), full_spec(b3),
            ],
            out_specs=pl.BlockSpec((1, cout_p, HW), lambda n: (n, 0, 0)),
        ),
        compiler_params=pltpu.CompilerParams(
            dimension_semantics=("parallel",)),
    )(x, masks, w_fused, b_fused, w2, b2, w3, b3)

    if cout_p != Cout:
        out = out[:, :Cout]
    return out.reshape(N, Cout, H, W)


def reference_forward(x_nchw, params):
    """Pure-JAX reference for correctness checking."""
    x = jnp.transpose(x_nchw, (0, 2, 3, 1))

    def conv(h, w, b):
        return jax.lax.conv_general_dilated(
            h, w, (1, 1), ((1, 1), (1, 1)),
            dimension_numbers=("NHWC", "HWIO", "NHWC")) + b

    short = conv(x, params["w_short"], params["b_short"])
    a = jax.nn.silu(conv(x, params["w_l1"], params["b_l1"]))
    a = jax.nn.silu(conv(a, params["w_l2"], params["b_l2"]))
    a = conv(a, params["w_l3"], params["b_l3"])
    return jnp.transpose(jax.nn.relu(a + short), (0, 3, 1, 2))


def init_params(key, ch_in, ch_out):
    ks = jax.random.split(key, 8)
    scale_in = 1.0 / np.sqrt(9 * ch_in)
    scale_out = 1.0 / np.sqrt(9 * ch_out)
    return {
        "w_short": jax.random.normal(ks[0], (3, 3, ch_in, ch_out), jnp.float32) * scale_in,
        "b_short": jax.random.normal(ks[1], (ch_out,), jnp.float32) * 0.01,
        "w_l1": jax.random.normal(ks[2], (3, 3, ch_in, ch_out), jnp.float32) * scale_in,
        "b_l1": jax.random.normal(ks[3], (ch_out,), jnp.float32) * 0.01,
        "w_l2": jax.random.normal(ks[4], (3, 3, ch_out, ch_out), jnp.float32) * scale_out,
        "b_l2": jax.random.normal(ks[5], (ch_out,), jnp.float32) * 0.01,
        "w_l3": jax.random.normal(ks[6], (3, 3, ch_out, ch_out), jnp.float32) * scale_out,
        "b_l3": jax.random.normal(ks[7], (ch_out,), jnp.float32) * 0.01,
    }


if __name__ == "__main__":
    N, CH_IN, CH_OUT, H, W = 2, 4, 8, 16, 16

    key = jax.random.PRNGKey(0)
    k_x, k_p = jax.random.split(key)
    x = jax.random.normal(k_x, (N, CH_IN, H, W), jnp.float32)   # NCHW like torch
    params = init_params(k_p, CH_IN, CH_OUT)

    out = jax.block_until_ready(extract_block_forward(x, params))
    ref = jax.block_until_ready(reference_forward(x, params))

    assert out.shape == (N, CH_OUT, H, W), out.shape
    np.testing.assert_allclose(np.asarray(out), np.asarray(ref),
                               rtol=1e-4, atol=1e-4)
    print("KERNEL_OK")
</pallas_src>

<mosaic_0001>
module attributes {stable_mosaic.version = 11 : i64} {
  func.func @_extract_block_kernel(%arg0: i32, %arg1: memref<1x8x256xf32, #tpu.memory_space<vmem>>, %arg2: memref<9x1x256xf32, #tpu.memory_space<vmem>>, %arg3: memref<16x72xf32, #tpu.memory_space<vmem>>, %arg4: memref<16x1xf32, #tpu.memory_space<vmem>>, %arg5: memref<8x72xf32, #tpu.memory_space<vmem>>, %arg6: memref<8x1xf32, #tpu.memory_space<vmem>>, %arg7: memref<8x72xf32, #tpu.memory_space<vmem>>, %arg8: memref<8x1xf32, #tpu.memory_space<vmem>>, %arg9: memref<1x8x256xf32, #tpu.memory_space<vmem>>) attributes {dimension_semantics = [#tpu.dimension_semantics<parallel>], iteration_bounds = array<i64: 2>, scalar_prefetch = 0 : i64, scratch_operands = 0 : i64, tpu.core_type = #tpu.core_type<tc>, window_params = [{transform_indices = @transform_0, window_bounds = array<i64: 1, 8, 256>}, {pipeline_mode = #tpu.pipeline_mode<synchronous>, transform_indices = @transform_1, window_bounds = array<i64: 9, 1, 256>}, {pipeline_mode = #tpu.pipeline_mode<synchronous>, transform_indices = @transform_2, window_bounds = array<i64: 16, 72>}, {pipeline_mode = #tpu.pipeline_mode<synchronous>, transform_indices = @transform_3, window_bounds = array<i64: 16, 1>}, {pipeline_mode = #tpu.pipeline_mode<synchronous>, transform_indices = @transform_4, window_bounds = array<i64: 8, 72>}, {pipeline_mode = #tpu.pipeline_mode<synchronous>, transform_indices = @transform_5, window_bounds = array<i64: 8, 1>}, {pipeline_mode = #tpu.pipeline_mode<synchronous>, transform_indices = @transform_6, window_bounds = array<i64: 8, 72>}, {pipeline_mode = #tpu.pipeline_mode<synchronous>, transform_indices = @transform_7, window_bounds = array<i64: 8, 1>}, {transform_indices = @transform_8, window_bounds = array<i64: 1, 8, 256>}]} {
    %c0 = arith.constant 0 : index
    %c0_0 = arith.constant 0 : index
    %c0_1 = arith.constant 0 : index
    %0 = vector.load %arg1[%c0, %c0_0, %c0_1] : memref<1x8x256xf32, #tpu.memory_space<vmem>>, vector<1x8x256xf32>
    %1 = vector.shape_cast %0 : vector<1x8x256xf32> to vector<8x256xf32>
    %c0_2 = arith.constant 0 : index
    %c0_3 = arith.constant 0 : index
    %c0_4 = arith.constant 0 : index
    %2 = vector.load %arg2[%c0_2, %c0_3, %c0_4] : memref<9x1x256xf32, #tpu.memory_space<vmem>>, vector<1x1x256xf32>
    %3 = vector.shape_cast %2 : vector<1x1x256xf32> to vector<1x256xf32>
    %c1 = arith.constant 1 : index
    %c0_5 = arith.constant 0 : index
    %c0_6 = arith.constant 0 : index
    %4 = vector.load %arg2[%c1, %c0_5, %c0_6] : memref<9x1x256xf32, #tpu.memory_space<vmem>>, vector<1x1x256xf32>
    %5 = vector.shape_cast %4 : vector<1x1x256xf32> to vector<1x256xf32>
    %c2 = arith.constant 2 : index
    %c0_7 = arith.constant 0 : index
    %c0_8 = arith.constant 0 : index
    %6 = vector.load %arg2[%c2, %c0_7, %c0_8] : memref<9x1x256xf32, #tpu.memory_space<vmem>>, vector<1x1x256xf32>
    %7 = vector.shape_cast %6 : vector<1x1x256xf32> to vector<1x256xf32>
    %c3 = arith.constant 3 : index
    %c0_9 = arith.constant 0 : index
    %c0_10 = arith.constant 0 : index
    %8 = vector.load %arg2[%c3, %c0_9, %c0_10] : memref<9x1x256xf32, #tpu.memory_space<vmem>>, vector<1x1x256xf32>
    %9 = vector.shape_cast %8 : vector<1x1x256xf32> to vector<1x256xf32>
    %c4 = arith.constant 4 : index
    %c0_11 = arith.constant 0 : index
    %c0_12 = arith.constant 0 : index
    %10 = vector.load %arg2[%c4, %c0_11, %c0_12] : memref<9x1x256xf32, #tpu.memory_space<vmem>>, vector<1x1x256xf32>
    %11 = vector.shape_cast %10 : vector<1x1x256xf32> to vector<1x256xf32>
    %c5 = arith.constant 5 : index
    %c0_13 = arith.constant 0 : index
    %c0_14 = arith.constant 0 : index
    %12 = vector.load %arg2[%c5, %c0_13, %c0_14] : memref<9x1x256xf32, #tpu.memory_space<vmem>>, vector<1x1x256xf32>
    %13 = vector.shape_cast %12 : vector<1x1x256xf32> to vector<1x256xf32>
    %c6 = arith.constant 6 : index
    %c0_15 = arith.constant 0 : index
    %c0_16 = arith.constant 0 : index
    %14 = vector.load %arg2[%c6, %c0_15, %c0_16] : memref<9x1x256xf32, #tpu.memory_space<vmem>>, vector<1x1x256xf32>
    %15 = vector.shape_cast %14 : vector<1x1x256xf32> to vector<1x256xf32>
    %c7 = arith.constant 7 : index
    %c0_17 = arith.constant 0 : index
    %c0_18 = arith.constant 0 : index
    %16 = vector.load %arg2[%c7, %c0_17, %c0_18] : memref<9x1x256xf32, #tpu.memory_space<vmem>>, vector<1x1x256xf32>
    %17 = vector.shape_cast %16 : vector<1x1x256xf32> to vector<1x256xf32>
    %c8 = arith.constant 8 : index
    %c0_19 = arith.constant 0 : index
    %c0_20 = arith.constant 0 : index
    %18 = vector.load %arg2[%c8, %c0_19, %c0_20] : memref<9x1x256xf32, #tpu.memory_space<vmem>>, vector<1x1x256xf32>
    %19 = vector.shape_cast %18 : vector<1x1x256xf32> to vector<1x256xf32>
    %c17_i32 = arith.constant 17 : i32
    %20 = tpu.dynamic_rotate %1 by %c17_i32 dim 1 : vector<8x256xf32>, i32 -> vector<8x256xf32>
    %21 = vector.broadcast %3 : vector<1x256xf32> to vector<8x256xf32>
    %22 = arith.mulf %20, %21 : vector<8x256xf32>
    %c16_i32 = arith.constant 16 : i32
    %23 = tpu.dynamic_rotate %1 by %c16_i32 dim 1 : vector<8x256xf32>, i32 -> vector<8x256xf32>
    %24 = vector.broadcast %5 : vector<1x256xf32> to vector<8x256xf32>
    %25 = arith.mulf %23, %24 : vector<8x256xf32>
    %c15_i32 = arith.constant 15 : i32
    %26 = tpu.dynamic_rotate %1 by %c15_i32 dim 1 : vector<8x256xf32>, i32 -> vector<8x256xf32>
    %27 = vector.broadcast %7 : vector<1x256xf32> to vector<8x256xf32>
    %28 = arith.mulf %26, %27 : vector<8x256xf32>
    %c1_i32 = arith.constant 1 : i32
    %29 = tpu.dynamic_rotate %1 by %c1_i32 dim 1 : vector<8x256xf32>, i32 -> vector<8x256xf32>
    %30 = vector.broadcast %9 : vector<1x256xf32> to vector<8x256xf32>
    %31 = arith.mulf %29, %30 : vector<8x256xf32>
    %32 = vector.broadcast %11 : vector<1x256xf32> to vector<8x256xf32>
    %33 = arith.mulf %1, %32 : vector<8x256xf32>
    %c255_i32 = arith.constant 255 : i32
    %34 = tpu.dynamic_rotate %1 by %c255_i32 dim 1 : vector<8x256xf32>, i32 -> vector<8x256xf32>
    %35 = vector.broadcast %13 : vector<1x256xf32> to vector<8x256xf32>
    %36 = arith.mulf %34, %35 : vector<8x256xf32>
    %c241_i32 = arith.constant 241 : i32
    %37 = tpu.dynamic_rotate %1 by %c241_i32 dim 1 : vector<8x256xf32>, i32 -> vector<8x256xf32>
    %38 = vector.broadcast %15 : vector<1x256xf32> to vector<8x256xf32>
    %39 = arith.mulf %37, %38 : vector<8x256xf32>
    %c240_i32 = arith.constant 240 : i32
    %40 = tpu.dynamic_rotate %1 by %c240_i32 dim 1 : vector<8x256xf32>, i32 -> vector<8x256xf32>
    %41 = vector.broadcast %17 : vector<1x256xf32> to vector<8x256xf32>
    %42 = arith.mulf %40, %41 : vector<8x256xf32>
    %c239_i32 = arith.constant 239 : i32
    %43 = tpu.dynamic_rotate %1 by %c239_i32 dim 1 : vector<8x256xf32>, i32 -> vector<8x256xf32>
    %44 = vector.broadcast %19 : vector<1x256xf32> to vector<8x256xf32>
    %45 = arith.mulf %43, %44 : vector<8x256xf32>
    %46 = tpu.concatenate %22, %25, %28, %31, %33, %36, %39, %42, %45 in 0 : vector<8x256xf32>, vector<8x256xf32>, vector<8x256xf32>, vector<8x256xf32>, vector<8x256xf32>, vector<8x256xf32>, vector<8x256xf32>, vector<8x256xf32>, vector<8x256xf32> -> vector<72x256xf32>
    %c0_21 = arith.constant 0 : index
    %c0_22 = arith.constant 0 : index
    %47 = vector.load %arg3[%c0_21, %c0_22] : memref<16x72xf32, #tpu.memory_space<vmem>>, vector<16x72xf32>
    %cst = arith.constant dense<0.000000e+00> : vector<16x256xf32>
    %48 = tpu.matmul %47, %46, %cst {dimension_numbers = #tpu.dot_dimension_numbers<[1], [0], [0], [1], [0, 0, 1, 1], [], []>} : vector<16x72xf32>, vector<72x256xf32>, vector<16x256xf32> -> vector<16x256xf32>
    %c0_23 = arith.constant 0 : index
    %c0_24 = arith.constant 0 : index
    %49 = vector.load %arg4[%c0_23, %c0_24] : memref<16x1xf32, #tpu.memory_space<vmem>>, vector<16x1xf32>
    %50 = vector.broadcast %49 : vector<16x1xf32> to vector<16x256xf32>
    %51 = arith.addf %48, %50 : vector<16x256xf32>
    %52 = vector.extract_strided_slice %51 {offsets = [0, 0], sizes = [8, 256], strides = [1, 1]} : vector<16x256xf32> to vector<8x256xf32>
    %53 = vector.extract_strided_slice %51 {offsets = [8, 0], sizes = [8, 256], strides = [1, 1]} : vector<16x256xf32> to vector<8x256xf32>
    %54 = arith.negf %53 : vector<8x256xf32>
    %55 = math.exp %54 : vector<8x256xf32>
    %cst_25 = arith.constant 1.000000e+00 : f32
    %56 = vector.broadcast %cst_25 : f32 to vector<8x256xf32>
    %57 = arith.addf %56, %55 : vector<8x256xf32>
    %58 = arith.divf %56, %57 : vector<8x256xf32>
    %59 = arith.mulf %53, %58 : vector<8x256xf32>
    %c17_i32_26 = arith.constant 17 : i32
    %60 = tpu.dynamic_rotate %59 by %c17_i32_26 dim 1 : vector<8x256xf32>, i32 -> vector<8x256xf32>
    %61 = vector.broadcast %3 : vector<1x256xf32> to vector<8x256xf32>
    %62 = arith.mulf %60, %61 : vector<8x256xf32>
    %c16_i32_27 = arith.constant 16 : i32
    %63 = tpu.dynamic_rotate %59 by %c16_i32_27 dim 1 : vector<8x256xf32>, i32 -> vector<8x256xf32>
    %64 = vector.broadcast %5 : vector<1x256xf32> to vector<8x256xf32>
    %65 = arith.mulf %63, %64 : vector<8x256xf32>
    %c15_i32_28 = arith.constant 15 : i32
    %66 = tpu.dynamic_rotate %59 by %c15_i32_28 dim 1 : vector<8x256xf32>, i32 -> vector<8x256xf32>
    %67 = vector.broadcast %7 : vector<1x256xf32> to vector<8x256xf32>
    %68 = arith.mulf %66, %67 : vector<8x256xf32>
    %c1_i32_29 = arith.constant 1 : i32
    %69 = tpu.dynamic_rotate %59 by %c1_i32_29 dim 1 : vector<8x256xf32>, i32 -> vector<8x256xf32>
    %70 = vector.broadcast %9 : vector<1x256xf32> to vector<8x256xf32>
    %71 = arith.mulf %69, %70 : vector<8x256xf32>
    %72 = vector.broadcast %11 : vector<1x256xf32> to vector<8x256xf32>
    %73 = arith.mulf %59, %72 : vector<8x256xf32>
    %c255_i32_30 = arith.constant 255 : i32
    %74 = tpu.dynamic_rotate %59 by %c255_i32_30 dim 1 : vector<8x256xf32>, i32 -> vector<8x256xf32>
    %75 = vector.broadcast %13 : vector<1x256xf32> to vector<8x256xf32>
    %76 = arith.mulf %74, %75 : vector<8x256xf32>
    %c241_i32_31 = arith.constant 241 : i32
    %77 = tpu.dynamic_rotate %59 by %c241_i32_31 dim 1 : vector<8x256xf32>, i32 -> vector<8x256xf32>
    %78 = vector.broadcast %15 : vector<1x256xf32> to vector<8x256xf32>
    %79 = arith.mulf %77, %78 : vector<8x256xf32>
    %c240_i32_32 = arith.constant 240 : i32
    %80 = tpu.dynamic_rotate %59 by %c240_i32_32 dim 1 : vector<8x256xf32>, i32 -> vector<8x256xf32>
    %81 = vector.broadcast %17 : vector<1x256xf32> to vector<8x256xf32>
    %82 = arith.mulf %80, %81 : vector<8x256xf32>
    %c239_i32_33 = arith.constant 239 : i32
    %83 = tpu.dynamic_rotate %59 by %c239_i32_33 dim 1 : vector<8x256xf32>, i32 -> vector<8x256xf32>
    %84 = vector.broadcast %19 : vector<1x256xf32> to vector<8x256xf32>
    %85 = arith.mulf %83, %84 : vector<8x256xf32>
    %86 = tpu.concatenate %62, %65, %68, %71, %73, %76, %79, %82, %85 in 0 : vector<8x256xf32>, vector<8x256xf32>, vector<8x256xf32>, vector<8x256xf32>, vector<8x256xf32>, vector<8x256xf32>, vector<8x256xf32>, vector<8x256xf32>, vector<8x256xf32> -> vector<72x256xf32>
    %c0_34 = arith.constant 0 : index
    %c0_35 = arith.constant 0 : index
    %87 = vector.load %arg5[%c0_34, %c0_35] : memref<8x72xf32, #tpu.memory_space<vmem>>, vector<8x72xf32>
    %cst_36 = arith.constant dense<0.000000e+00> : vector<8x256xf32>
    %88 = tpu.matmul %87, %86, %cst_36 {dimension_numbers = #tpu.dot_dimension_numbers<[1], [0], [0], [1], [0, 0, 1, 1], [], []>} : vector<8x72xf32>, vector<72x256xf32>, vector<8x256xf32> -> vector<8x256xf32>
    %c0_37 = arith.constant 0 : index
    %c0_38 = arith.constant 0 : index
    %89 = vector.load %arg6[%c0_37, %c0_38] : memref<8x1xf32, #tpu.memory_space<vmem>>, vector<8x1xf32>
    %90 = vector.broadcast %89 : vector<8x1xf32> to vector<8x256xf32>
    %91 = arith.addf %88, %90 : vector<8x256xf32>
    %92 = arith.negf %91 : vector<8x256xf32>
    %93 = math.exp %92 : vector<8x256xf32>
    %cst_39 = arith.constant 1.000000e+00 : f32
    %94 = vector.broadcast %cst_39 : f32 to vector<8x256xf32>
    %95 = arith.addf %94, %93 : vector<8x256xf32>
    %96 = arith.divf %94, %95 : vector<8x256xf32>
    %97 = arith.mulf %91, %96 : vector<8x256xf32>
    %c17_i32_40 = arith.constant 17 : i32
    %98 = tpu.dynamic_rotate %97 by %c17_i32_40 dim 1 : vector<8x256xf32>, i32 -> vector<8x256xf32>
    %99 = vector.broadcast %3 : vector<1x256xf32> to vector<8x256xf32>
    %100 = arith.mulf %98, %99 : vector<8x256xf32>
    %c16_i32_41 = arith.constant 16 : i32
    %101 = tpu.dynamic_rotate %97 by %c16_i32_41 dim 1 : vector<8x256xf32>, i32 -> vector<8x256xf32>
    %102 = vector.broadcast %5 : vector<1x256xf32> to vector<8x256xf32>
    %103 = arith.mulf %101, %102 : vector<8x256xf32>
    %c15_i32_42 = arith.constant 15 : i32
    %104 = tpu.dynamic_rotate %97 by %c15_i32_42 dim 1 : vector<8x256xf32>, i32 -> vector<8x256xf32>
    %105 = vector.broadcast %7 : vector<1x256xf32> to vector<8x256xf32>
    %106 = arith.mulf %104, %105 : vector<8x256xf32>
    %c1_i32_43 = arith.constant 1 : i32
    %107 = tpu.dynamic_rotate %97 by %c1_i32_43 dim 1 : vector<8x256xf32>, i32 -> vector<8x256xf32>
    %108 = vector.broadcast %9 : vector<1x256xf32> to vector<8x256xf32>
    %109 = arith.mulf %107, %108 : vector<8x256xf32>
    %110 = vector.broadcast %11 : vector<1x256xf32> to vector<8x256xf32>
    %111 = arith.mulf %97, %110 : vector<8x256xf32>
    %c255_i32_44 = arith.constant 255 : i32
    %112 = tpu.dynamic_rotate %97 by %c255_i32_44 dim 1 : vector<8x256xf32>, i32 -> vector<8x256xf32>
    %113 = vector.broadcast %13 : vector<1x256xf32> to vector<8x256xf32>
    %114 = arith.mulf %112, %113 : vector<8x256xf32>
    %c241_i32_45 = arith.constant 241 : i32
    %115 = tpu.dynamic_rotate %97 by %c241_i32_45 dim 1 : vector<8x256xf32>, i32 -> vector<8x256xf32>
    %116 = vector.broadcast %15 : vector<1x256xf32> to vector<8x256xf32>
    %117 = arith.mulf %115, %116 : vector<8x256xf32>
    %c240_i32_46 = arith.constant 240 : i32
    %118 = tpu.dynamic_rotate %97 by %c240_i32_46 dim 1 : vector<8x256xf32>, i32 -> vector<8x256xf32>
    %119 = vector.broadcast %17 : vector<1x256xf32> to vector<8x256xf32>
    %120 = arith.mulf %118, %119 : vector<8x256xf32>
    %c239_i32_47 = arith.constant 239 : i32
    %121 = tpu.dynamic_rotate %97 by %c239_i32_47 dim 1 : vector<8x256xf32>, i32 -> vector<8x256xf32>
    %122 = vector.broadcast %19 : vector<1x256xf32> to vector<8x256xf32>
    %123 = arith.mulf %121, %122 : vector<8x256xf32>
    %124 = tpu.concatenate %100, %103, %106, %109, %111, %114, %117, %120, %123 in 0 : vector<8x256xf32>, vector<8x256xf32>, vector<8x256xf32>, vector<8x256xf32>, vector<8x256xf32>, vector<8x256xf32>, vector<8x256xf32>, vector<8x256xf32>, vector<8x256xf32> -> vector<72x256xf32>
    %c0_48 = arith.constant 0 : index
    %c0_49 = arith.constant 0 : index
    %125 = vector.load %arg7[%c0_48, %c0_49] : memref<8x72xf32, #tpu.memory_space<vmem>>, vector<8x72xf32>
    %cst_50 = arith.constant dense<0.000000e+00> : vector<8x256xf32>
    %126 = tpu.matmul %125, %124, %cst_50 {dimension_numbers = #tpu.dot_dimension_numbers<[1], [0], [0], [1], [0, 0, 1, 1], [], []>} : vector<8x72xf32>, vector<72x256xf32>, vector<8x256xf32> -> vector<8x256xf32>
    %c0_51 = arith.constant 0 : index
    %c0_52 = arith.constant 0 : index
    %127 = vector.load %arg8[%c0_51, %c0_52] : memref<8x1xf32, #tpu.memory_space<vmem>>, vector<8x1xf32>
    %128 = vector.broadcast %127 : vector<8x1xf32> to vector<8x256xf32>
    %129 = arith.addf %126, %128 : vector<8x256xf32>
    %130 = arith.addf %129, %52 : vector<8x256xf32>
    %cst_53 = arith.constant 0.000000e+00 : f32
    %131 = vector.broadcast %cst_53 : f32 to vector<8x256xf32>
    %132 = arith.maximumf %130, %131 : vector<8x256xf32>
    %c0_54 = arith.constant 0 : index
    %c0_55 = arith.constant 0 : index
    %c0_56 = arith.constant 0 : index
    %133 = vector.load %arg9[%c0_54, %c0_55, %c0_56] : memref<1x8x256xf32, #tpu.memory_space<vmem>>, vector<1x8x256xf32>
    %134 = vector.shape_cast %133 : vector<1x8x256xf32> to vector<8x256xf32>
    %135 = vector.shape_cast %132 : vector<8x256xf32> to vector<1x8x256xf32>
    tpu.vector_store %arg9[%c0_54, %c0_55, %c0_56], %135 {strides = array<i32>} : memref<1x8x256xf32, #tpu.memory_space<vmem>>, vector<1x8x256xf32>,
    return
  }
  func.func @transform_0(%arg0: i32) -> (i32, i32, i32) {
    %c0_i32 = arith.constant 0 : i32
    %c0_i32_0 = arith.constant 0 : i32
    %c0_i32_1 = arith.constant 0 : i32
    return %arg0, %c0_i32, %c0_i32_0 : i32, i32, i32
  }
  func.func @transform_1(%arg0: i32) -> (i32, i32, i32) {
    %c0_i32 = arith.constant 0 : i32
    %c0_i32_0 = arith.constant 0 : i32
    %c0_i32_1 = arith.constant 0 : i32
    %c0_i32_2 = arith.constant 0 : i32
    return %c0_i32, %c0_i32_0, %c0_i32_1 : i32, i32, i32
  }
  func.func @transform_2(%arg0: i32) -> (i32, i32) {
    %c0_i32 = arith.constant 0 : i32
    %c0_i32_0 = arith.constant 0 : i32
    %c0_i32_1 = arith.constant 0 : i32
    return %c0_i32, %c0_i32_0 : i32, i32
  }
  func.func @transform_3(%arg0: i32) -> (i32, i32) {
    %c0_i32 = arith.constant 0 : i32
    %c0_i32_0 = arith.constant 0 : i32
    %c0_i32_1 = arith.constant 0 : i32
    return %c0_i32, %c0_i32_0 : i32, i32
  }
  func.func @transform_4(%arg0: i32) -> (i32, i32) {
    %c0_i32 = arith.constant 0 : i32
    %c0_i32_0 = arith.constant 0 : i32
    %c0_i32_1 = arith.constant 0 : i32
    return %c0_i32, %c0_i32_0 : i32, i32
  }
  func.func @transform_5(%arg0: i32) -> (i32, i32) {
    %c0_i32 = arith.constant 0 : i32
    %c0_i32_0 = arith.constant 0 : i32
    %c0_i32_1 = arith.constant 0 : i32
    return %c0_i32, %c0_i32_0 : i32, i32
  }
  func.func @transform_6(%arg0: i32) -> (i32, i32) {
    %c0_i32 = arith.constant 0 : i32
    %c0_i32_0 = arith.constant 0 : i32
    %c0_i32_1 = arith.constant 0 : i32
    return %c0_i32, %c0_i32_0 : i32, i32
  }
  func.func @transform_7(%arg0: i32) -> (i32, i32) {
    %c0_i32 = arith.constant 0 : i32
    %c0_i32_0 = arith.constant 0 : i32
    %c0_i32_1 = arith.constant 0 : i32
    return %c0_i32, %c0_i32_0 : i32, i32
  }
  func.func @transform_8(%arg0: i32) -> (i32, i32, i32) {
    %c0_i32 = arith.constant 0 : i32
    %c0_i32_0 = arith.constant 0 : i32
    %c0_i32_1 = arith.constant 0 : i32
    return %arg0, %c0_i32, %c0_i32_0 : i32, i32, i32
  }
}

</mosaic_0001>

<bundles_post_ra>
// kernel: tpu_custom_call.1
= control target key start
LH: loop header
LB: loop body
LE: loop exit
PB: predicated region body
PF: predicated region fallthrough
CT: control target
= control target key end

     0   :  { %13 = vsyncpa [#allocation3], 0  ;;  %s1865_s0 = inlined_call_operand.vmem [shape: f32[2,8,256], index: 0, kind: input, shape index: {}]   ;;  %s1866_s1 = inlined_call_operand.hbm [shape: f32[9,1,256], index: 1, kind: input, shape index: {}]   ;;  %s1867_s2 = inlined_call_operand.hbm [shape: f32[16,72], index: 2, kind: input, shape index: {}]   ;;  %s1868_s3 = inlined_call_operand.vmem [shape: f32[16,1], index: 3, kind: input, shape index: {}]   ;;  %s1869_s4 = inlined_call_operand.vmem [shape: f32[8,72], index: 4, kind: input, shape index: {}]   ;;  %s1870_s5 = inlined_call_operand.vmem [shape: f32[8,1], index: 5, kind: input, shape index: {}]   ;;  %s1871_s6 = inlined_call_operand.hbm [shape: f32[8,72], index: 6, kind: input, shape index: {}]   ;;  %s1872_s7 = inlined_call_operand.vmem [shape: f32[8,1], index: 7, kind: input, shape index: {}]   ;;  %s1873_s8 = inlined_call_operand.hbm [shape: f32[2,8,256], index: 8, kind: output, shape index: {}]  }
   0x1   :  { %14 = vsyncpa [#allocation6], 0 }
   0x2   :  { %15 = vsyncpa [#allocation4], 0 }
   0x3   :  { %17 = vsyncpa [#allocation4 + $0x1], 0  ;;  %s1412_s27 = smov 0   ;;  %s1414_s28 = smov 0  }
   0x4   :  { %s1416_s29 = smov 0   ;;  %s1418_s30 = smov 0  }
   0x5 LB: > { %s1433_s9 = sadd.s32 4294967295, %s1347_s30   ;;  %s1071_s10 = sadd.s32 4294967294, %s1347_s30   ;;  %s1347_s30 = sphi %s1418_s30, %s1887_s30   ;;  %s1343_s29 = sphi %s1416_s29, %s1886_s29   ;;  %s1339_s28 = sphi %s1414_s28, %s1885_s28   ;;  %s1335_s27 = sphi %s1412_s27, %s1884_s27  }
   0x6   : > { %s1437_s11 = sadd.s32 1, %s1347_s30   ;;  %s203_s12 = sadd.s32 1, %s1343_s29 }
   0x7   : > { %s200_s13 = ssub.s32 %s1347_s30, %s1437_s11  ;;  %p213_p0 = scmp.ne.s32.totalorder %s1343_s29, %s1339_s28 }
   0x8   : > { %p201_p1 = scmp.eq.s32.totalorder %s200_s13, 0  ;;  %p214_p2 = scmp.eq.s32.totalorder %s1433_s9, 1 }
   0x9   : > { %p219_p3 = scmp.ne.s32.totalorder %s1339_s28, %s1335_s27  ;;  %p220_p4 = scmp.eq.s32.totalorder %s1071_s10, 1 }
   0xa   : > { %s1448_s14 = scalar_select %p201_p1, %s1343_s29, %s203_s12  }
   0xb   : > { %p1450_p5 = por %p214_p2, %p213_p0  ;;  %p1454_p6 = por %p220_p4, %p219_p3 }
   0xc   : > { %p1072_p7 = scmp.ge.s32.totalorder %s1347_s30, 1  ;;  %p227_p8 = scmp.lt.s32.totalorder %s1347_s30, 3 }
   0xd   : > { %s1876_s16 = scalar_select %p1454_p6, 1, 0 }
   0xe   : > { %p1874_p9 = scmp.eq.s32.totalorder %s1433_s9, 0  ;;  %p1461_p10 = pnand %p1072_p7, %p227_p8 }
   0xf   : > { %s1349_s18 = smov [#allocation5]   ;;  %s1350_s21 = smov [#allocation2]  }
  0x10   : > { %s252_s19 = sshll.u32 %s1349_s18, 4  ;;  %p1113_p11 = pneg %p1461_p10  ;;  %s253_s19 = int_to_ptr.vmem [resolvable:$true] %s252_s19 }
  0x11   : > { %s239_s22 = sshll.u32 %s1350_s21, 4  ;;  %s1212_s23 = scalar_lea.vmem %s253_s19, 256  ;;  %s240_s22 = int_to_ptr.vmem [resolvable:$true] %s239_s22 }
  0x12   : > { %p1469_p12 = pnand %p1874_p9, %p1113_p11  ;;  %p1213_p0 = scmp.ne.s32.totalorder %s253_s19, %s1212_s23 }
  0x13   : > { %p1220_p3 = scmp.lt.s32.totalorder %s253_s19, %s253_s19  ;;  %p1221_p4 = scmp.lt.s32.totalorder %s1212_s23, %s1212_s23 }
  0x14   : > { %p1203_p13 = pneg %p1469_p12 }
  0x15   : > { %p1222_p7 = por %p1221_p4, %p1220_p3 }
  0x16   : > { %p1215_p1 = pnand %p1213_p0, %p1203_p13 }
  0x18   : > { %p1216_p2 = pneg %p1215_p1 }
  0x1a   : > { %p1223_p8 = pnand %p1222_p7, %p1216_p2 }
  0x1c   : > { %1226 = shalt.err (!%p1223_p8)
}
  0x1d   : > { %s1351_s24 = smov 128   ;;  %s1352_s25 = smov 8  }
  0x1e   : > { %1119 = dma.hbm_to_vmem [thread:$0]  (!%p1469_p12), %s1867_s2, 256, %s253_s19, [#allocation6], %s1351_s24, %s1351_s24, %s1352_s25  }
  0x1f   : > { %s1238_s12 = scalar_lea.vmem %s240_s22, 288  ;;  %p1246_p9 = scmp.lt.s32.totalorder %s240_s22, %s240_s22 }
  0x20   : > { %p1239_p11 = scmp.ne.s32.totalorder %s240_s22, %s1238_s12  ;;  %p1247_p6 = scmp.lt.s32.totalorder %s1238_s12, %s1238_s12 }
  0x22   : > { %p1241_p0 = pnand %p1239_p11, %p1203_p13  ;;  %p1248_p3 = por %p1247_p6, %p1246_p9 }
  0x24   : > { %p1242_p1 = pneg %p1241_p0 }
  0x26   : > { %p1249_p2 = pnand %p1248_p3, %p1242_p1 }
  0x28   : > { %1252 = shalt.err (!%p1249_p2)
}
  0x29   : > { %s1353_s13 = smov 32   ;;  %s1354_s18 = smov 2  }
  0x2a   : > { %1116 = dma.hbm_to_vmem [thread:$0]  (!%p1469_p12), %s1866_s1, 288, %s240_s22, [#allocation3], %s1353_s13, %s1353_s13, %s1354_s18  }
  0x2b   : > { %s1355_s19 = smov [#allocation7]  }
  0x2c   : > { %s275_s24 = sshll.u32 %s1355_s19, 4  ;;  %s276_s24 = int_to_ptr.vmem [resolvable:$true] %s275_s24 }
  0x2d   : > { %s1264_s25 = scalar_lea.vmem %s276_s24, 128  ;;  %p1272_p9 = scmp.lt.s32.totalorder %s276_s24, %s276_s24 }
  0x2e   : > { %p1265_p4 = scmp.ne.s32.totalorder %s276_s24, %s1264_s25  ;;  %p1273_p8 = scmp.lt.s32.totalorder %s1264_s25, %s1264_s25 }
  0x30   : > { %p1267_p7 = pnand %p1265_p4, %p1203_p13  ;;  %p1274_p11 = por %p1273_p8, %p1272_p9 }
  0x32   : > { %p1268_p6 = pneg %p1267_p7 }
  0x34   : > { %p1275_p0 = pnand %p1274_p11, %p1268_p6 }
  0x36   : > { %1278 = shalt.err (!%p1275_p0)
}
  0x37   : > { %1122 = dma.hbm_to_vmem [thread:$0]  (!%p1469_p12), %s1871_s6, 128, %s276_s24, [#allocation6]  }
  0x38   : > { %299 = sbr.rel (%p1461_p10) target bundleno = 1198 (0x4ae), region = 52  ;;  %p1879_p1 = scmp.eq.s32.totalorder (!%p1461_p10), %s1433_s9, 0 }
  0x3d   : > { %1322 = dma.done.wait (%p1879_p1), [#allocation3], 288   ;;  %p1880_p13 = pmov %p1879_p1 }
  0x3e   : > { %p1881_p3 = pmov %p1879_p1 }
  0x3f   : > { %1324 = vsyncadd (%p1880_p13), [#allocation3], 4294967008 }
  0x40   : > { %1326 = dma.done.wait (%p1881_p3), [#allocation6], 384   ;;  %p1882_p2 = pmov %p1879_p1 }
  0x41   : > { %p341_p4 = scmp.lt.s32.totalorder %s1433_s9, 1  ;;  %s1356_s18 = smov 112   ;;  %v1361_v2 = vmov 0.0   ;;  %v1364_v3 = vmov 0   ;;  %v543_v4 = vld [vmem:[%s1868_s3 + $0x8] sm:$0xff]  ;;  %v369_v5 = vlaneseq  ;;  %vm554_vm8 = vcmask 588800  }
  0x42   : > { %1328 = vsyncadd (%p1882_p2), [#allocation6], 4294966912  ;;  %s1357_s21 = smov 111   ;;  %s1358_s23 = smov 113   ;;  %625 = vmatprep.mubr.f32.mxu0 %v1361_v2  ;;  %792 = vmatprep.mubr.f32.mxu1 %v1361_v2  ;;  %v364_v10 = vld [vmem:[#allocation2 + $0x10] sm:$0x3] }
  0x43   : > { %s342_s20 = scalar_select %p341_p4, %s1433_s9, 1  ;;  %1183 = vset.pattern.permute.xlu0 %v1364_v3  ;;  %1184 = vset.pattern.permute.xlu1 %v1364_v3  ;;  %v376_v6 = vshrl.u32 %v369_v5, 7  ;;  %v1555_v7 = vand.u32 127, %v369_v5  ;;  %v362_v13 = vld [vmem:[#allocation2 + $0xe] sm:$0x3] }
  0x44   : > { %s1359_s19 = smov 127   ;;  %s1360_s24 = smov 1   ;;  %v360_v15 = vld [vmem:[#allocation2 + $0xc] sm:$0x3]  ;;  %v358_v29 = vld [vmem:[#allocation2 + $0xa] sm:$0x3] }
  0x45   : > { %s1097_s22 = sshll.u32 %s342_s20, 4  ;;  %s1362_s25 = smov 15   ;;  %v1557_v8 = vsub.s32 0, %v376_v6  ;;  %v1559_v9 = vsub.s32 1, %v376_v6  ;;  %vm504_vm0 = vcmp.lt.s32.totalorder %v1555_v7, 112  ;;  %vm524_vm1 = vcmp.lt.s32.totalorder %v1555_v7, 111 }
  0x46   : > { %s345_s13 = scalar_lea.vmem %s1865_s0, %s1097_s22  ;;  %s1363_s26 = smov 16   ;;  %vm484_vm2 = vcmp.lt.s32.totalorder %v1555_v7, 113  ;;  %v356_v30 = vld [vmem:[#allocation2 + $0x8] sm:$0x3]  ;;  %vm464_vm3 = vcmp.lt.s32.totalorder %v1555_v7, 127  ;;  %vm431_vm4 = vcmp.lt.s32.totalorder %v1555_v7, 1 }
  0x47   : > { %v1514_v0 = vld [vmem:[%s345_s13] sm:$0xff]  ;;  %v1520_v1 = vld [vmem:[%s345_s13 + $0x8] sm:$0xff]  ;;  %s1365_s10 = smov 17   ;;  %v1564_v14 = vrot.slane %v364_v10, %v1559_v9  ;;  %v1567_v16 = vrot.slane %v364_v10, %v1557_v8  ;;  %v1570_v17 = vrot.slane %v362_v13, %v1557_v8  ;;  %v1573_v18 = vrot.slane %v362_v13, %v1559_v9 }
  0x48   : > { %500 = vrot.lane.b32.xlu1 %v1514_v0, %s1356_s18  ;;  %520 = vrot.lane.b32.xlu0 %v1514_v0, %s1357_s21  ;;  %v1583_v24 = vrot.slane %v360_v15, %v1557_v8  ;;  %v1589_v27 = vrot.slane %v360_v15, %v1559_v9  ;;  %v1600_v37 = vrot.slane %v358_v29, %v1557_v8  ;;  %v354_v41 = vld [vmem:[#allocation2 + $0x6] sm:$0x3]  ;;  %v352_v54 = vld [vmem:[#allocation2 + $0x4] sm:$0x3]  ;;  %vm411_vm5 = vcmp.lt.s32.totalorder %v1555_v7, 15 }
  0x49   : > { %v1605_v40 = vrot.slane %v358_v29, %v1559_v9  ;;  %v1608_v42 = vrot.slane %v356_v30, %v1559_v9  ;;  %v1611_v43 = vrot.slane %v356_v30, %v1557_v8  ;;  %v1619_v48 = vrot.slane %v354_v41, %v1557_v8  ;;  %v350_v63 = vld [vmem:[#allocation2 + $0x2] sm:$0x3] }
  0x4a   : > { %v1624_v51 = vrot.slane %v354_v41, %v1559_v9  ;;  %v1638_v61 = vrot.slane %v352_v54, %v1557_v8  ;;  %v1641_v62 = vrot.slane %v352_v54, %v1559_v9  ;;  %vm391_vm6 = vcmp.lt.s32.totalorder %v1555_v7, 16 }
  0x4b   : > { %v459_v52 = vmul.f32 %v1608_v42, %v1520_v1  ;;  %v458_v53 = vmul.f32 %v1611_v43, %v1514_v0  ;;  %v1651_v10 = vrot.slane %v350_v63, %v1557_v8  ;;  %vm371_vm7 = vcmp.lt.s32.totalorder %v1555_v7, 17 }
  0x4c   : > { %502 = vrot.lane.b32.xlu1 %v1520_v1, %s1356_s18  ;;  %522 = vrot.lane.b32.xlu0 %v1520_v1, %s1357_s21 }
  0x50   : > { %482 = vrot.lane.b32.xlu1 %v1520_v1, %s1358_s23  ;;  %480 = vrot.lane.b32.xlu0 %v1514_v0, %s1358_s23 }
  0x54   : > { %462 = vrot.lane.b32.xlu1 %v1520_v1, %s1359_s19  ;;  %460 = vrot.lane.b32.xlu0 %v1514_v0, %s1359_s19 }
  0x58   : > { %429 = vrot.lane.b32.xlu1 %v1520_v1, %s1360_s24  ;;  %427 = vrot.lane.b32.xlu0 %v1514_v0, %s1360_s24 }
  0x5c   : > { %409 = vrot.lane.b32.xlu1 %v1520_v1, %s1362_s25  ;;  %407 = vrot.lane.b32.xlu0 %v1514_v0, %s1362_s25 }
  0x60   : > { %389 = vrot.lane.b32.xlu1 %v1520_v1, %s1363_s26  ;;  %387 = vrot.lane.b32.xlu0 %v1514_v0, %s1363_s26 }
  0x64   : > { %367 = vrot.lane.b32.xlu1 %v1520_v1, %s1365_s10  ;;  %365 = vrot.lane.b32.xlu0 %v1514_v0, %s1365_s10 }
  0x68   : > { %551 = vperm.xlu0 %1183, %v543_v4  }
  0xba   : > { %v501_v11 = vpop.permute.xlu1 %500  ;;  %v521_v12 = vpop.permute.xlu0 %520 }
  0xbe   : > { %v503_v19 = vpop.permute.xlu1 %502  ;;  %v523_v20 = vpop.permute.xlu0 %522 }
  0xbf   : > { %v506_v21 = vsel %vm504_vm0, %v503_v19, %v501_v11  ;;  %v525_v22 = vsel %vm524_vm1, %v521_v12, %v523_v20  ;;  %v526_v23 = vsel %vm524_vm1, %v523_v20, %v521_v12  ;;  %v505_v25 = vsel %vm504_vm0, %v501_v11, %v503_v19  ;;  %v348_v12 = vld [vmem:[#allocation2] sm:$0x3] }
  0xc0   : > { %v539_v26 = vmul.f32 %v1564_v14, %v526_v23  ;;  %v538_v28 = vmul.f32 %v1567_v16, %v525_v22  ;;  %v519_v31 = vmul.f32 %v1573_v18, %v506_v21  ;;  %v518_v34 = vmul.f32 %v1570_v17, %v505_v25 }
  0xc1   : > { %v1654_v11 = vrot.slane %v350_v63, %v1559_v9  ;;  %v1664_v23 = vrot.slane %v348_v12, %v1557_v8  ;;  %v1667_v25 = vrot.slane %v348_v12, %v1559_v9  ;;  %v541_v8 = vld [vmem:[#allocation5 + $0x8] sm:$0xff] }
  0xc2   : > { %v483_v32 = vpop.permute.xlu1 %482  ;;  %575 = vmatprep.subr.mxu0 %v539_v26  ;;  %v481_v33 = vpop.permute.xlu0 %480 }
  0xc3   : > { %v485_v35 = vsel %vm484_vm2, %v481_v33, %v483_v32  ;;  %v486_v36 = vsel %vm484_vm2, %v483_v32, %v481_v33  ;;  %576 = vmatpush1.msra.mxu0 %v538_v28  ;;  %v540_v33 = vld [vmem:[#allocation5] sm:$0xff] }
  0xc4   : > { %v498_v38 = vmul.f32 %v1583_v24, %v485_v35  ;;  %v499_v39 = vmul.f32 %v1589_v27, %v486_v36  ;;  %577 = vmatprep.subr.mxu0 %v519_v31 }
  0xc5   : > { %578 = vmatpush1.msra.mxu0 %v518_v34 }
  0xc6   : > { %v463_v44 = vpop.permute.xlu1 %462  ;;  %579 = vmatprep.subr.mxu0 %v499_v39  ;;  %v461_v45 = vpop.permute.xlu0 %460 }
  0xc7   : > { %v465_v46 = vsel %vm464_vm3, %v461_v45, %v463_v44  ;;  %v466_v47 = vsel %vm464_vm3, %v463_v44, %v461_v45  ;;  %580 = vmatpush1.msra.mxu0 %v498_v38 }
  0xc8   : > { %v478_v49 = vmul.f32 %v1600_v37, %v465_v46  ;;  %v479_v50 = vmul.f32 %v1605_v40, %v466_v47 }
  0xca   : > { %v430_v55 = vpop.permute.xlu1 %429  ;;  %581 = vmatprep.subr.mxu0 %v479_v50  ;;  %v428_v56 = vpop.permute.xlu0 %427 }
  0xcb   : > { %v432_v57 = vsel %vm431_vm4, %v428_v56, %v430_v55  ;;  %v433_v58 = vsel %vm431_vm4, %v430_v55, %v428_v56  ;;  %582 = vmatpush1.msra.mxu0 %v478_v49  ;;  %v719_v55 = vld [vmem:[%s1870_s5] sm:$0xff] }
  0xcc   : > { %v445_v59 = vmul.f32 %v1619_v48, %v433_v58  ;;  %v446_v60 = vmul.f32 %v1624_v51, %v432_v57  ;;  %583 = vmatprep.subr.mxu0 %v459_v52 }
  0xcd   : > { %584 = vmatpush1.msra.mxu0 %v458_v53 }
  0xce   : > { %v410_v0 = vpop.permute.xlu1 %409  ;;  %v408_v1 = vpop.permute.xlu0 %407  ;;  %585 = vmatprep.subr.mxu0 %v446_v60 }
  0xcf   : > { %v412_v3 = vsel %vm411_vm5, %v408_v1, %v410_v0  ;;  %v413_v4 = vsel %vm411_vm5, %v410_v0, %v408_v1  ;;  %586 = vmatpush1.msra.mxu0 %v445_v59 }
  0xd0   : > { %v425_v5 = vmul.f32 %v1638_v61, %v413_v4  ;;  %v426_v6 = vmul.f32 %v1641_v62, %v412_v3 }
  0xd2   : > { %v390_v13 = vpop.permute.xlu1 %389  ;;  %v388_v15 = vpop.permute.xlu0 %387  ;;  %587 = vmatprep.subr.mxu0 %v426_v6 }
  0xd3   : > { %v392_v19 = vsel %vm391_vm6, %v388_v15, %v390_v13  ;;  %v393_v20 = vsel %vm391_vm6, %v390_v13, %v388_v15  ;;  %588 = vmatpush1.msra.mxu0 %v425_v5 }
  0xd4   : > { %v405_v21 = vmul.f32 %v1651_v10, %v393_v20  ;;  %v406_v22 = vmul.f32 %v1654_v11, %v392_v19 }
  0xd6   : > { %v368_v26 = vpop.permute.xlu1 %367  ;;  %v366_v28 = vpop.permute.xlu0 %365  ;;  %589 = vmatprep.subr.mxu0 %v406_v22 }
  0xd7   : > { %v372_v29 = vsel %vm371_vm7, %v366_v28, %v368_v26  ;;  %v373_v30 = vsel %vm371_vm7, %v368_v26, %v366_v28  ;;  %590 = vmatpush1.msra.mxu0 %v405_v21 }
  0xd8   : > { %v385_v31 = vmul.f32 %v1664_v23, %v373_v30  ;;  %v386_v32 = vmul.f32 %v1667_v25, %v372_v29 }
  0xda   : > { %591 = vmatprep.subr.mxu0 %v386_v32 }
  0xdb   : > { %592 = vmatpush1.msra.mxu0 %v385_v31 }
  0xdc   : > { %1084 = vmatmul.mubr.msk.f32.vlgmr.msra.gmra.mxu0 %vm554_vm8, %v540_v33 }
  0xdd   : > { %631 = vmatprep.mubr.f32.mxu0 %v1361_v2 }
  0xe0   : > { %1085 = vmatmul.mubr.msk.f32.gmra.mxu0 %vm554_vm8, %v541_v8 }
  0xe1   : > { %953 = vmatprep.mubr.f32.mxu0 %v1361_v2 }
  0xe3   : > { %v552_v35 = vpop.permute.xlu0 %551 }
 0x19c   : > { %v1679_v9 = vpop.f32.mrf.mxu0 }
 0x19e   : > { %v1681_v34 = vpop.f32.mrf.mxu0 }
 0x1a0   : > { %v633_v36 = vpop.f32.mrf.mxu0 }
 0x1a1   : > { %v634_v38 = vadd.f32 %v633_v36, %v552_v35 }
 0x1a2   : > { %v635_v39 = vpop.f32.mrf.mxu0 }
 0x1a3   : > { %v1086_v41 = vmul.f32 -1.442695, %v634_v38  ;;  %v636_v44 = vadd.f32 %v635_v39, %v552_v35 }
 0x1a5   : > { %1185 = vpow2.f32 %v1086_v41  ;;  %v1087_v45 = vmul.f32 -1.442695, %v636_v44 }
 0x1a7   : > { %1187 = vpow2.f32 %v1087_v45 }
 0x1b2   : > { %v1186_v46 = vpop.eup %1185 }
 0x1b3   : > { %v644_v47 = vadd.f32 1.0, %v1186_v46 }
 0x1b4   : > { %v1188_v49 = vpop.eup %1187 }
 0x1b5   : > { %1189 = vrcp.f32 %v644_v47  ;;  %v645_v50 = vadd.f32 1.0, %v1188_v49 }
 0x1b7   : > { %1191 = vrcp.f32 %v645_v50 }
 0x1c2   : > { %v1190_v2 = vpop.eup %1189 }
 0x1c3   : > { %v650_v52 = vmul.f32 %v1190_v2, %v634_v38 }
 0x1c4   : > { %v1192_v53 = vpop.eup %1191 }
 0x1c5   : > { %702 = vrot.lane.b32.xlu0 %v650_v52, %s1356_s18  ;;  %710 = vrot.lane.b32.xlu1 %v650_v52, %s1357_s21  ;;  %v651_v54 = vmul.f32 %v1192_v53, %v636_v44  ;;  %v684_v39 = vmul.f32 %v650_v52, %v1611_v43 }
 0x1c7   : > { %v685_v35 = vmul.f32 %v651_v54, %v1608_v42 }
 0x1c9   : > { %694 = vrot.lane.b32.xlu0 %v650_v52, %s1358_s23  ;;  %712 = vrot.lane.b32.xlu1 %v651_v54, %s1357_s21 }
 0x1cd   : > { %686 = vrot.lane.b32.xlu0 %v650_v52, %s1359_s19  ;;  %704 = vrot.lane.b32.xlu1 %v651_v54, %s1356_s18 }
 0x1d1   : > { %676 = vrot.lane.b32.xlu0 %v650_v52, %s1360_s24  ;;  %696 = vrot.lane.b32.xlu1 %v651_v54, %s1358_s23 }
 0x1d5   : > { %668 = vrot.lane.b32.xlu0 %v650_v52, %s1362_s25  ;;  %688 = vrot.lane.b32.xlu1 %v651_v54, %s1359_s19 }
 0x1d9   : > { %660 = vrot.lane.b32.xlu0 %v650_v52, %s1363_s26  ;;  %678 = vrot.lane.b32.xlu1 %v651_v54, %s1360_s24 }
 0x1dd   : > { %652 = vrot.lane.b32.xlu0 %v650_v52, %s1365_s10  ;;  %670 = vrot.lane.b32.xlu1 %v651_v54, %s1362_s25 }
 0x1e1   : > { %722 = vperm.xlu0 %1183, %v719_v55   ;;  %662 = vrot.lane.b32.xlu1 %v651_v54, %s1363_s26 }
 0x1e5   : > { %654 = vrot.lane.b32.xlu1 %v651_v54, %s1365_s10 }
 0x237   : > { %v703_v56 = vpop.permute.xlu0 %702  ;;  %v711_v57 = vpop.permute.xlu1 %710 }
 0x23b   : > { %v695_v58 = vpop.permute.xlu0 %694  ;;  %v713_v59 = vpop.permute.xlu1 %712 }
 0x23c   : > { %v714_v60 = vsel %vm524_vm1, %v711_v57, %v713_v59  ;;  %v715_v63 = vsel %vm524_vm1, %v713_v59, %v711_v57 }
 0x23d   : > { %v717_v0 = vmul.f32 %v715_v63, %v1564_v14  ;;  %v716_v1 = vmul.f32 %v714_v60, %v1567_v16 }
 0x23f   : > { %v687_v3 = vpop.permute.xlu0 %686  ;;  %742 = vmatprep.subr.mxu1 %v717_v0  ;;  %v705_v4 = vpop.permute.xlu1 %704 }
 0x240   : > { %v706_v5 = vsel %vm504_vm0, %v703_v56, %v705_v4  ;;  %v707_v6 = vsel %vm504_vm0, %v705_v4, %v703_v56  ;;  %743 = vmatpush1.msra.mxu1 %v716_v1  ;;  %v718_v1 = vld [vmem:[%s1869_s4] sm:$0xff] }
 0x241   : > { %v708_v12 = vmul.f32 %v706_v5, %v1570_v17  ;;  %v709_v13 = vmul.f32 %v707_v6, %v1573_v18 }
 0x243   : > { %744 = vmatprep.subr.mxu1 %v709_v13  ;;  %v697_v15 = vpop.permute.xlu1 %696  ;;  %v677_v21 = vpop.permute.xlu0 %676 }
 0x244   : > { %v698_v19 = vsel %vm484_vm2, %v695_v58, %v697_v15  ;;  %v699_v20 = vsel %vm484_vm2, %v697_v15, %v695_v58  ;;  %745 = vmatpush1.msra.mxu1 %v708_v12 }
 0x245   : > { %v700_v22 = vmul.f32 %v698_v19, %v1583_v24  ;;  %v701_v26 = vmul.f32 %v699_v20, %v1589_v27 }
 0x247   : > { %746 = vmatprep.subr.mxu1 %v701_v26  ;;  %v689_v28 = vpop.permute.xlu1 %688  ;;  %v669_v33 = vpop.permute.xlu0 %668 }
 0x248   : > { %v690_v29 = vsel %vm464_vm3, %v687_v3, %v689_v28  ;;  %v691_v30 = vsel %vm464_vm3, %v689_v28, %v687_v3  ;;  %747 = vmatpush1.msra.mxu1 %v700_v22 }
 0x249   : > { %v692_v31 = vmul.f32 %v690_v29, %v1600_v37  ;;  %v693_v32 = vmul.f32 %v691_v30, %v1605_v40 }
 0x24b   : > { %748 = vmatprep.subr.mxu1 %v693_v32  ;;  %v679_v8 = vpop.permute.xlu1 %678  ;;  %v661_v49 = vpop.permute.xlu0 %660  ;;  %v880_v32 = vld [vmem:[%s1872_s7] sm:$0xff] }
 0x24c   : > { %v680_v36 = vsel %vm431_vm4, %v677_v21, %v679_v8  ;;  %v681_v38 = vsel %vm431_vm4, %v679_v8, %v677_v21  ;;  %749 = vmatpush1.msra.mxu1 %v692_v31  ;;  %v542_v31 = vld [vmem:[%s1868_s3] sm:$0xff] }
 0x24d   : > { %v682_v41 = vmul.f32 %v681_v38, %v1619_v48  ;;  %v683_v44 = vmul.f32 %v680_v36, %v1624_v51  ;;  %750 = vmatprep.subr.mxu1 %v685_v35 }
 0x24e   : > { %751 = vmatpush1.msra.mxu1 %v684_v39 }
 0x24f   : > { %v671_v45 = vpop.permute.xlu1 %670  ;;  %752 = vmatprep.subr.mxu1 %v683_v44  ;;  %v653_v57 = vpop.permute.xlu0 %652 }
 0x250   : > { %v672_v46 = vsel %vm411_vm5, %v669_v33, %v671_v45  ;;  %v673_v47 = vsel %vm411_vm5, %v671_v45, %v669_v33  ;;  %753 = vmatpush1.msra.mxu1 %v682_v41 }
 0x251   : > { %v674_v50 = vmul.f32 %v673_v47, %v1638_v61  ;;  %v675_v2 = vmul.f32 %v672_v46, %v1641_v62 }
 0x253   : > { %v663_v52 = vpop.permute.xlu1 %662  ;;  %754 = vmatprep.subr.mxu1 %v675_v2 }
 0x254   : > { %v664_v53 = vsel %vm391_vm6, %v661_v49, %v663_v52  ;;  %v665_v54 = vsel %vm391_vm6, %v663_v52, %v661_v49  ;;  %755 = vmatpush1.msra.mxu1 %v674_v50 }
 0x255   : > { %v666_v55 = vmul.f32 %v665_v54, %v1651_v10  ;;  %v667_v56 = vmul.f32 %v664_v53, %v1654_v11 }
 0x257   : > { %v655_v58 = vpop.permute.xlu1 %654  ;;  %756 = vmatprep.subr.mxu1 %v667_v56 }
 0x258   : > { %v656_v59 = vsel %vm371_vm7, %v653_v57, %v655_v58  ;;  %v657_v60 = vsel %vm371_vm7, %v655_v58, %v653_v57  ;;  %757 = vmatpush1.msra.mxu1 %v666_v55 }
 0x259   : > { %v658_v63 = vmul.f32 %v657_v60, %v1664_v23  ;;  %v659_v0 = vmul.f32 %v656_v59, %v1667_v25 }
 0x25b   : > { %758 = vmatprep.subr.mxu1 %v659_v0 }
 0x25c   : > { %759 = vmatpush1.msra.mxu1 %v658_v63  ;;  %v723_v3 = vpop.permute.xlu0 %722 }
 0x25d   : > { %1088 = vmatmul.mubr.msk.f32.vlgmr.msra.gmra.mxu1 %vm554_vm8, %v718_v1 }
 0x31d   : > { %v794_v4 = vpop.f32.mrf.mxu1 }
 0x31e   : > { %v795_v5 = vadd.f32 %v794_v4, %v723_v3 }
 0x31f   : > { %v796_v6 = vpop.f32.mrf.mxu1 }
 0x320   : > { %v1089_v12 = vmul.f32 -1.442695, %v795_v5  ;;  %v797_v13 = vadd.f32 %v796_v6, %v723_v3 }
 0x322   : > { %1193 = vpow2.f32 %v1089_v12  ;;  %v1090_v15 = vmul.f32 -1.442695, %v797_v13 }
 0x324   : > { %1195 = vpow2.f32 %v1090_v15 }
 0x32f   : > { %v1194_v19 = vpop.eup %1193 }
 0x330   : > { %v805_v20 = vadd.f32 1.0, %v1194_v19 }
 0x331   : > { %v1196_v21 = vpop.eup %1195 }
 0x332   : > { %1197 = vrcp.f32 %v805_v20  ;;  %v806_v22 = vadd.f32 1.0, %v1196_v21 }
 0x334   : > { %1199 = vrcp.f32 %v806_v22  ;;  %v879_v22 = vld [vmem:[#allocation7] sm:$0xff] }
 0x33f   : > { %v1198_v26 = vpop.eup %1197 }
 0x340   : > { %v811_v28 = vmul.f32 %v1198_v26, %v795_v5 }
 0x341   : > { %v1200_v29 = vpop.eup %1199 }
 0x342   : > { %v812_v30 = vmul.f32 %v1200_v29, %v797_v13  ;;  %871 = vrot.lane.b32.xlu1 %v811_v28, %s1357_s21  ;;  %v845_v63 = vmul.f32 %v811_v28, %v1611_v43 }
 0x344   : > { %873 = vrot.lane.b32.xlu0 %v812_v30, %s1357_s21  ;;  %s1366_s21 = smov [#allocation8]  }
 0x346   : > { %863 = vrot.lane.b32.xlu1 %v811_v28, %s1356_s18 }
 0x348   : > { %865 = vrot.lane.b32.xlu0 %v812_v30, %s1356_s18 }
 0x34a   : > { %855 = vrot.lane.b32.xlu1 %v811_v28, %s1358_s23 }
 0x34c   : > { %857 = vrot.lane.b32.xlu0 %v812_v30, %s1358_s23 }
 0x34e   : > { %847 = vrot.lane.b32.xlu1 %v811_v28, %s1359_s19 }
 0x350   : > { %849 = vrot.lane.b32.xlu0 %v812_v30, %s1359_s19 }
 0x352   : > { %837 = vrot.lane.b32.xlu1 %v811_v28, %s1360_s24 }
 0x354   : > { %839 = vrot.lane.b32.xlu0 %v812_v30, %s1360_s24  ;;  %s338_s24 = sand.u32 1, %s1339_s28  }
 0x355   : > { %s967_s20 = scalar_lea.sflag [#allocation4], %s338_s24 }
 0x356   : > { %829 = vrot.lane.b32.xlu1 %v811_v28, %s1362_s25 }
 0x358   : > { %831 = vrot.lane.b32.xlu0 %v812_v30, %s1362_s25  ;;  %s1081_s25 = sshll.u32 %s338_s24, 4 }
 0x35a   : > { %821 = vrot.lane.b32.xlu1 %v811_v28, %s1363_s26 }
 0x35c   : > { %823 = vrot.lane.b32.xlu0 %v812_v30, %s1363_s26  ;;  %s1098_s26 = sshll.u32 %s1433_s9, 8  ;;  %s1283_s9 = sshll.u32 %s1366_s21, 4  ;;  %s1284_s9 = int_to_ptr.vmem [resolvable:$false] %s1283_s9 }
 0x35d   : > { %s979_s13 = scalar_lea.hbm %s1873_s8, %s1098_s26  ;;  %s1285_s23 = scalar_lea.vmem %s1284_s9, 512 }
 0x35e   : > { %813 = vrot.lane.b32.xlu1 %v811_v28, %s1365_s10 }
 0x360   : > { %815 = vrot.lane.b32.xlu0 %v812_v30, %s1365_s10  ;;  %s340_s10 = scalar_lea.vmem [#allocation8], %s1081_s25 }
 0x361   : > { %s981_s22 = sshll.u32 %s340_s10, 4  ;;  %s982_s22 = int_to_ptr.vmem [resolvable:$true] %s981_s22 }
 0x362   : > { %546 = vperm.xlu1 %1184, %v542_v31   ;;  %s1279_s18 = scalar_lea.vmem %s982_s22, 256  ;;  %p1286_p6 = scmp.lt.s32.totalorder %s982_s22, %s1284_s9 }
 0x363   : > { %p1280_p10 = scmp.ne.s32.totalorder %s982_s22, %s1279_s18  ;;  %p1287_p9 = scmp.lt.s32.totalorder %s1285_s23, %s1279_s18 }
 0x364   : > { %883 = vperm.xlu0 %1183, %v880_v32  }
 0x365   : > { %p1281_p12 = pnand %p1280_p10, %p1450_p5  ;;  %p1288_p8 = por %p1287_p9, %p1286_p6 }
 0x367   : > { %p1282_p7 = pneg %p1281_p12 }
 0x369   : > { %p1289_p11 = pnand %p1288_p8, %p1282_p7 }
 0x3b4   : > { %v872_v33 = vpop.permute.xlu1 %871 }
 0x3b6   : > { %v874_v8 = vpop.permute.xlu0 %873 }
 0x3b7   : > { %v875_v35 = vsel %vm524_vm1, %v872_v33, %v874_v8  ;;  %v876_v36 = vsel %vm524_vm1, %v874_v8, %v872_v33 }
 0x3b8   : > { %v877_v38 = vmul.f32 %v875_v35, %v1567_v16  ;;  %v878_v39 = vmul.f32 %v876_v36, %v1564_v14  ;;  %v864_v41 = vpop.permute.xlu1 %863 }
 0x3ba   : > { %v866_v44 = vpop.permute.xlu0 %865  ;;  %903 = vmatprep.subr.mxu0 %v878_v39 }
 0x3bb   : > { %v867_v45 = vsel %vm504_vm0, %v864_v41, %v866_v44  ;;  %v868_v46 = vsel %vm504_vm0, %v866_v44, %v864_v41  ;;  %904 = vmatpush1.msra.mxu0 %v877_v38 }
 0x3bc   : > { %v869_v47 = vmul.f32 %v867_v45, %v1570_v17  ;;  %v870_v49 = vmul.f32 %v868_v46, %v1573_v18  ;;  %v856_v50 = vpop.permute.xlu1 %855 }
 0x3be   : > { %v858_v2 = vpop.permute.xlu0 %857  ;;  %905 = vmatprep.subr.mxu0 %v870_v49 }
 0x3bf   : > { %v859_v14 = vsel %vm484_vm2, %v856_v50, %v858_v2  ;;  %v860_v16 = vsel %vm484_vm2, %v858_v2, %v856_v50  ;;  %906 = vmatpush1.msra.mxu0 %v869_v47 }
 0x3c0   : > { %v861_v52 = vmul.f32 %v859_v14, %v1583_v24  ;;  %v862_v53 = vmul.f32 %v860_v16, %v1589_v27  ;;  %v848_v54 = vpop.permute.xlu1 %847  ;;  %v846_v24 = vmul.f32 %v812_v30, %v1608_v42 }
 0x3c2   : > { %v850_v55 = vpop.permute.xlu0 %849  ;;  %907 = vmatprep.subr.mxu0 %v862_v53 }
 0x3c3   : > { %v851_v17 = vsel %vm464_vm3, %v848_v54, %v850_v55  ;;  %v852_v18 = vsel %vm464_vm3, %v850_v55, %v848_v54  ;;  %908 = vmatpush1.msra.mxu0 %v861_v52 }
 0x3c4   : > { %v853_v56 = vmul.f32 %v851_v17, %v1600_v37  ;;  %v854_v57 = vmul.f32 %v852_v18, %v1605_v40  ;;  %v838_v58 = vpop.permute.xlu1 %837 }
 0x3c6   : > { %v840_v59 = vpop.permute.xlu0 %839  ;;  %909 = vmatprep.subr.mxu0 %v854_v57 }
 0x3c7   : > { %v841_v27 = vsel %vm431_vm4, %v838_v58, %v840_v59  ;;  %v842_v60 = vsel %vm431_vm4, %v840_v59, %v838_v58  ;;  %910 = vmatpush1.msra.mxu0 %v853_v56 }
 0x3c8   : > { %v843_v0 = vmul.f32 %v842_v60, %v1619_v48  ;;  %v844_v37 = vmul.f32 %v841_v27, %v1624_v51  ;;  %911 = vmatprep.subr.mxu0 %v846_v24  ;;  %v830_v40 = vpop.permute.xlu1 %829 }
 0x3c9   : > { %912 = vmatpush1.msra.mxu0 %v845_v63 }
 0x3ca   : > { %v832_v1 = vpop.permute.xlu0 %831  ;;  %913 = vmatprep.subr.mxu0 %v844_v37 }
 0x3cb   : > { %v833_v42 = vsel %vm411_vm5, %v830_v40, %v832_v1  ;;  %v834_v3 = vsel %vm411_vm5, %v832_v1, %v830_v40  ;;  %914 = vmatpush1.msra.mxu0 %v843_v0 }
 0x3cc   : > { %v835_v4 = vmul.f32 %v834_v3, %v1638_v61  ;;  %v836_v43 = vmul.f32 %v833_v42, %v1641_v62  ;;  %v822_v5 = vpop.permute.xlu1 %821 }
 0x3ce   : > { %v824_v48 = vpop.permute.xlu0 %823  ;;  %915 = vmatprep.subr.mxu0 %v836_v43 }
 0x3cf   : > { %v825_v51 = vsel %vm391_vm6, %v822_v5, %v824_v48  ;;  %v826_v6 = vsel %vm391_vm6, %v824_v48, %v822_v5  ;;  %916 = vmatpush1.msra.mxu0 %v835_v4 }
 0x3d0   : > { %v827_v12 = vmul.f32 %v826_v6, %v1651_v10  ;;  %v828_v13 = vmul.f32 %v825_v51, %v1654_v11  ;;  %v814_v15 = vpop.permute.xlu1 %813 }
 0x3d2   : > { %v816_v19 = vpop.permute.xlu0 %815  ;;  %917 = vmatprep.subr.mxu0 %v828_v13 }
 0x3d3   : > { %v817_v61 = vsel %vm371_vm7, %v814_v15, %v816_v19  ;;  %v818_v62 = vsel %vm371_vm7, %v816_v19, %v814_v15  ;;  %918 = vmatpush1.msra.mxu0 %v827_v12 }
 0x3d4   : > { %v819_v20 = vmul.f32 %v818_v62, %v1664_v23  ;;  %v820_v21 = vmul.f32 %v817_v61, %v1667_v25 }
 0x3d6   : > { %919 = vmatprep.subr.mxu0 %v820_v21 }
 0x3d7   : > { %920 = vmatpush1.msra.mxu0 %v819_v20 }
 0x3d8   : > { %1091 = vmatmul.mubr.msk.f32.vlgmr.msra.gmra.mxu0 %vm554_vm8, %v879_v22 }
 0x3dd   : > { %v547_v10 = vpop.permute.xlu1 %546 }
 0x3de   : > { %v628_v28 = vadd.f32 %v1679_v9, %v547_v10  ;;  %v630_v30 = vadd.f32 %v1681_v34, %v547_v10 }
 0x3df   : > { %v884_v11 = vpop.permute.xlu0 %883 }
 0x498   : > { %v955_v26 = vpop.f32.mrf.mxu0 }
 0x499   : > { %v956_v7 = vadd.f32 %v955_v26, %v884_v11 }
 0x49a   : > { %v957_v29 = vpop.f32.mrf.mxu0 }
 0x49b   : > { %v960_v23 = vadd.f32 %v956_v7, %v628_v28  ;;  %v958_v25 = vadd.f32 %v957_v29, %v884_v11 }
 0x49d   : > { %v962_v31 = vmax.f32 %v960_v23, 0.0  ;;  %v961_v32 = vadd.f32 %v958_v25, %v630_v30 }
 0x49f   : > { %964 = vst [vmem:[%s340_s10] sm:$0xff] %v962_v31  ;;  %v963_v33 = vmax.f32 %v961_v32, 0.0 }
 0x4a1   : > { %965 = vst [vmem:[%s340_s10 + $0x8] sm:$0xff] %v963_v33 }
 0x4a2   : > { %1292 = shalt.err (!%p1289_p11)
}
 0x4a3   : > { %s1293_s19 = scalar_lea.hbm %s979_s13, 256  ;;  %s1297_s26 = scalar_lea.hbm %s1873_s8, 512 }
 0x4a4   : > { %p1294_p0 = scmp.ne.s32.totalorder %s979_s13, %s1293_s19  ;;  %p1298_p3 = scmp.lt.s32.totalorder %s979_s13, %s1873_s8 }
 0x4a5   : > { %p1299_p2 = scmp.lt.s32.totalorder %s1297_s26, %s1293_s19 }
 0x4a6   : > { %p1295_p1 = pnand %p1294_p0, %p1450_p5 }
 0x4a7   : > { %p1300_p4 = por %p1299_p2, %p1298_p3 }
 0x4a8   : > { %p1296_p13 = pneg %p1295_p1 }
 0x4aa   : > { %p1301_p10 = pnand %p1300_p4, %p1296_p13 }
 0x4ac   : > { %1304 = shalt.err (!%p1301_p10)
}
 0x4ad   : > { %1111 = dma.vmem_to_hbm [thread:$0]  (%p1450_p5), %s982_s22, 256, %s979_s13, %s967_s20  }
 0x4ae PF: > { %p1133_p12 = scmp.ge.s32.totalorder %s1347_s30, 2  ;;  %s993_s17 = sand.u32 1, %s1335_s27  }
 0x4af   : > { %p1883_p7 = scmp.ne.s32.totalorder %s1876_s16, 0  ;;  %s994_s18 = scalar_lea.sflag [#allocation4], %s993_s17 }
 0x4b1   : > { %p1124_p6 = pnand %p1133_p12, %p1883_p7 }
 0x4b3   : > { %p1125_p9 = pneg %p1124_p6 }
 0x4b5   : > { %1330 = dma.done.wait (%p1125_p9), %s994_s18, 256  }
 0x4b6   : > { %1332 = vsyncadd (%p1125_p9), %s994_s18, 4294967040  ;;  %p20_p8 = scmp.ge.s32.totalorder %s1437_s11, 4   ;;  %s1884_s27 = smov %s1339_s28 }
 0x4b7   : > { %s1885_s28 = smov %s1343_s29  ;;  %s1886_s29 = smov %s1448_s14 }
 0x4b8   : > { %s1887_s30 = smov %s1437_s11  ;;  %22 = sbr.rel (!%p20_p8) target bundleno = 5 (0x5), region = 108 }
 0x4bd   :  { %999 = vsyncpa [#allocation3], 1 }
 0x4be   :  { %1001 = vsyncpa [#allocation3 + $0x1], 1 }
 0x4bf   :  { %1002 = vsyncpa [#allocation6], 1 }
 0x4c0   :  { %1003 = vsyncpa [#allocation4], 1 }
 0x4c1   :  { %1005 = vsyncpa [#allocation4 + $0x1], 1 }

</bundles_post_ra>
